<compile_context>
chip_gen: v7x
topology: tpu7x:2x2x1
jax: 0.10.0
libtpu: 0.0.40
codegen_flags: <defaults>
</compile_context>

<pallas_src>
import functools

import jax
import jax.numpy as jnp
from jax import lax
from jax.experimental import pallas as pl
from jax.experimental.pallas import tpu as pltpu


_DEFAULT_TILE_N = 64 * 1024  # (16, 64K) f32 tile = 4 MiB per pipeline buffer


def _round_up(x, m):
    return (x + m - 1) // m * m


def _ceil_div(a, b):
    return -(-a // b)


def make_focal_loss_kernel(label_num, label_tag_num, gamma=2, temperature=1.0,
                           reduction="mean", tile_n=None):
    """Returns a callable(predict, labels, label_tags, alpha=None) -> scalar loss."""
    if reduction not in ("mean", "sum"):
        # TODO(synk): reduction='none' (per-example loss vector) not implemented.
        raise NotImplementedError("only 'mean' and 'sum' reductions are supported")

    inv_temp = float(1.0 / float(temperature))

    def kernel(tiles_per_part, n_true, predict_ref, labels_ref, tags_ref,
               alpha_ref, out_ref, acc_ref):
        # predict_ref: (C, TILE_N)      labels_ref: (1, TILE_N) i32
        # tags_ref:    (1, TILE_N) i32  alpha_ref:  (T, 1) f32
        # out_ref:     (1, 1) f32       acc_ref:    (1, TILE_N) f32 scratch
        t = pl.program_id(1)

        @pl.when(t == 0)
        def _init():
            acc_ref[...] = jnp.zeros_like(acc_ref)

        x = predict_ref[...].astype(jnp.float32)                # (C, TILE_N)
        if float(temperature) != 1.0:                           # trace-time branch
            x = x * jnp.float32(inv_temp)

        c, tn = x.shape

        # log_softmax along the class (sublane) axis.
        m = jnp.max(x, axis=0, keepdims=True)                   # (1, TILE_N)
        z = x - m
        lse = jnp.log(jnp.sum(jnp.exp(z), axis=0, keepdims=True))
        logp = z - lse                                          # (C, TILE_N)

        # One-hot(label) gather of the true-class log-prob via sublane compare.
        cls_iota = lax.broadcasted_iota(jnp.int32, (c, tn), 0)
        class_mask = (cls_iota == labels_ref[...]).astype(jnp.float32)
        probs = jnp.sum(logp * class_mask, axis=0, keepdims=True)   # (1, TILE_N)

        # Per-example alpha = alpha[label_tags] via sublane one-hot reduction.
        tcount = alpha_ref.shape[0]
        tag_iota = lax.broadcasted_iota(jnp.int32, (tcount, tn), 0)
        tag_mask = (tag_iota == tags_ref[...]).astype(jnp.float32)
        alpha_g = jnp.sum(tag_mask * alpha_ref[...], axis=0, keepdims=True)

        # Focal loss; gamma is a compile-time constant (integer_pow for int gamma).
        loss = -alpha_g * ((1.0 - probs) ** gamma) * probs      # (1, TILE_N)

        # Mask padded batch columns (ragged last tile / padded last part).
        col0 = (pl.program_id(0) * tiles_per_part + t) * tn
        lane = lax.broadcasted_iota(jnp.int32, (1, tn), 1)
        loss = jnp.where(col0 + lane < n_true, loss, 0.0)

        acc_ref[...] += loss

        @pl.when(t == pl.num_programs(1) - 1)
        def _finalize():
            out_ref[...] = jnp.sum(acc_ref[...], axis=1, keepdims=True)

    @jax.jit
    def run(predict, labels, label_tags, alpha=None):
        n, c = predict.shape
        if c != label_num:
            raise ValueError("predict class dim does not match label_num")
        if alpha is None:
            alpha = jnp.ones((label_tag_num, 1), jnp.float32)

        base_tile = _DEFAULT_TILE_N if tile_n is None else int(tile_n)
        base_tile = max(128, _round_up(base_tile, 128))
        tn = min(base_tile, _round_up(n, 128))

        num_tiles = _ceil_div(n, tn)
        num_parts = 2 if num_tiles >= 2 else 1      # v7x: shard tiles over 2 TCs
        tiles_per_part = _ceil_div(num_tiles, num_parts)
        n_pad = num_parts * tiles_per_part * tn

        # Lane-dense layout: batch on lanes, classes / tags on sublanes.
        predict_t = jnp.pad(predict.T, ((0, 0), (0, n_pad - n)))
        labels_row = jnp.pad(labels.reshape(1, -1).astype(jnp.int32),
                             ((0, 0), (0, n_pad - n)))
        tags_row = jnp.pad(label_tags.reshape(1, -1).astype(jnp.int32),
                           ((0, 0), (0, n_pad - n)))
        alpha_col = jnp.reshape(alpha, (label_tag_num, 1)).astype(jnp.float32)

        kern = functools.partial(kernel, tiles_per_part, n)

        partials = pl.pallas_call(
            kern,
            out_shape=jax.ShapeDtypeStruct((num_parts, 1), jnp.float32),
            grid_spec=pltpu.PrefetchScalarGridSpec(
                num_scalar_prefetch=0,
                grid=(num_parts, tiles_per_part),
                in_specs=[
                    pl.BlockSpec((c, tn),
                                 lambda p, t: (0, p * tiles_per_part + t)),
                    pl.BlockSpec((1, tn),
                                 lambda p, t: (0, p * tiles_per_part + t)),
                    pl.BlockSpec((1, tn),
                                 lambda p, t: (0, p * tiles_per_part + t)),
                    pl.BlockSpec((label_tag_num, 1), lambda p, t: (0, 0)),
                ],
                out_specs=pl.BlockSpec((1, 1), lambda p, t: (p, 0)),
                scratch_shapes=[pltpu.VMEM((1, tn), jnp.float32)],
            ),
            compiler_params=pltpu.CompilerParams(
                dimension_semantics=("parallel", "arbitrary"),
                vmem_limit_bytes=32 * 1024 * 1024,
            ),
        )(predict_t, labels_row, tags_row, alpha_col)

        total = jnp.sum(partials)
        if reduction == "mean":
            total = total / jnp.float32(n)
        return total

    return run


def focal_loss_reference(predict, labels, label_tags, alpha,
                         label_num, gamma, temperature):
    """Plain-JAX reference matching the PyTorch module semantics."""
    pt = jax.nn.log_softmax(predict / temperature, axis=-1)
    class_mask = jax.nn.one_hot(labels, label_num, dtype=pt.dtype)
    a = alpha.reshape(-1)[label_tags.reshape(-1)].reshape(-1, 1)
    probs = jnp.sum(pt * class_mask, axis=1).reshape(-1, 1)
    loss = -a * jnp.power(1.0 - probs, gamma) * probs
    return jnp.mean(loss)


if __name__ == "__main__":
    label_num = 16
    label_tag_num = 4

    def make_inputs(key, n):
        k1, k2, k3, k4 = jax.random.split(key, 4)
        predict = jax.random.normal(k1, (n, label_num), dtype=jnp.float32)
        labels = jax.random.randint(k2, (n,), 0, label_num, dtype=jnp.int32)
        tags = jax.random.randint(k3, (n,), 0, label_tag_num, dtype=jnp.int32)
        alpha = jax.random.uniform(k4, (label_tag_num, 1), dtype=jnp.float32,
                                   minval=0.5, maxval=1.5)
        return predict, labels, tags, alpha

    key = jax.random.PRNGKey(0)
    ka, kb = jax.random.split(key)

    # Case 1: module defaults (alpha=None -> ones, temperature=1); N not a
    #         multiple of 128 -> exercises the ragged-tail mask.
    predict, labels, tags, _ = make_inputs(ka, 200)
    focal = make_focal_loss_kernel(label_num, label_tag_num, gamma=2,
                                   temperature=1.0)
    got = jax.block_until_ready(focal(predict, labels, tags))
    want = focal_loss_reference(predict, labels, tags,
                                jnp.ones((label_tag_num, 1), jnp.float32),
                                label_num, 2, 1.0)
    assert jnp.allclose(got, want, rtol=1e-5, atol=1e-5), (got, want)

    # Case 2: custom alpha + temperature, tiny tile to exercise the multi-tile
    #         accumulator and the 2-way parallel (per-core) partial split.
    predict, labels, tags, alpha = make_inputs(kb, 300)
    focal2 = make_focal_loss_kernel(label_num, label_tag_num, gamma=2,
                                    temperature=2.0, tile_n=128)
    got2 = jax.block_until_ready(focal2(predict, labels, tags, alpha))
    want2 = focal_loss_reference(predict, labels, tags, alpha,
                                 label_num, 2, 2.0)
    assert jnp.allclose(got2, want2, rtol=1e-5, atol=1e-5), (got2, want2)

    print("KERNEL_OK")
</pallas_src>

<mosaic_0001>
module attributes {stable_mosaic.version = 11 : i64} {
  func.func @kernel(%arg0: i32, %arg1: i32, %arg2: memref<16x256xf32, #tpu.memory_space<vmem>>, %arg3: memref<1x256xi32, #tpu.memory_space<vmem>>, %arg4: memref<1x256xi32, #tpu.memory_space<vmem>>, %arg5: memref<4x1xf32, #tpu.memory_space<vmem>>, %arg6: memref<1x1xf32, #tpu.memory_space<vmem>>, %arg7: memref<1x256xf32, #tpu.memory_space<vmem>>) attributes {dimension_semantics = [#tpu.dimension_semantics<parallel>, #tpu.dimension_semantics<arbitrary>], iteration_bounds = array<i64: 1, 1>, scalar_prefetch = 0 : i64, scratch_operands = 1 : i64, tpu.core_type = #tpu.core_type<tc>, window_params = [{transform_indices = @transform_0, window_bounds = array<i64: 16, 256>}, {transform_indices = @transform_1, window_bounds = array<i64: 1, 256>}, {transform_indices = @transform_2, window_bounds = array<i64: 1, 256>}, {pipeline_mode = #tpu.pipeline_mode<synchronous>, transform_indices = @transform_3, window_bounds = array<i64: 4, 1>}, {transform_indices = @transform_4, window_bounds = array<i64: 1, 1>}]} {
    %c0_i32 = arith.constant 0 : i32
    %0 = arith.cmpi eq, %arg1, %c0_i32 : i32
    %1 = arith.extui %0 : i1 to i32
    %c0_i32_0 = arith.constant 0 : i32
    %2 = arith.cmpi ne, %1, %c0_i32_0 : i32
    scf.if %2 {
      %cst_20 = arith.constant 0.000000e+00 : f32
      %57 = vector.broadcast %cst_20 : f32 to vector<1x256xf32>
      %c0_21 = arith.constant 0 : index
      %c0_22 = arith.constant 0 : index
      %58 = vector.load %arg7[%c0_21, %c0_22] : memref<1x256xf32, #tpu.memory_space<vmem>>, vector<1x256xf32>
      tpu.vector_store %arg7[%c0_21, %c0_22], %57 {strides = array<i32>} : memref<1x256xf32, #tpu.memory_space<vmem>>, vector<1x256xf32>,
    } else {
    }
    %c0 = arith.constant 0 : index
    %c0_1 = arith.constant 0 : index
    %3 = vector.load %arg2[%c0, %c0_1] : memref<16x256xf32, #tpu.memory_space<vmem>>, vector<16x256xf32>
    %cst = arith.constant dense<0xFF800000> : vector<256xf32>
    %4 = vector.multi_reduction <maximumf>, %3, %cst [0] : vector<16x256xf32> to vector<256xf32>
    %5 = vector.shape_cast %4 : vector<256xf32> to vector<1x256xf32>
    %6 = vector.broadcast %5 : vector<1x256xf32> to vector<16x256xf32>
    %7 = arith.subf %3, %6 : vector<16x256xf32>
    %8 = math.exp %7 : vector<16x256xf32>
    %cst_2 = arith.constant dense<0.000000e+00> : vector<256xf32>
    %9 = vector.multi_reduction <add>, %8, %cst_2 [0] : vector<16x256xf32> to vector<256xf32>
    %10 = vector.shape_cast %9 : vector<256xf32> to vector<1x256xf32>
    %11 = math.log %10 : vector<1x256xf32>
    %12 = vector.broadcast %11 : vector<1x256xf32> to vector<16x256xf32>
    %13 = arith.subf %7, %12 : vector<16x256xf32>
    %14 = tpu.iota {dimensions = array<i32: 0>} : vector<16x256xi32>
    %c0_3 = arith.constant 0 : index
    %c0_4 = arith.constant 0 : index
    %15 = vector.load %arg3[%c0_3, %c0_4] : memref<1x256xi32, #tpu.memory_space<vmem>>, vector<1x256xi32>
    %16 = vector.broadcast %15 : vector<1x256xi32> to vector<16x256xi32>
    %17 = arith.cmpi eq, %14, %16 : vector<16x256xi32>
    %18 = arith.extui %17 : vector<16x256xi1> to vector<16x256xi32>
    %19 = arith.sitofp %18 : vector<16x256xi32> to vector<16x256xf32>
    %20 = arith.mulf %13, %19 : vector<16x256xf32>
    %cst_5 = arith.constant dense<0.000000e+00> : vector<256xf32>
    %21 = vector.multi_reduction <add>, %20, %cst_5 [0] : vector<16x256xf32> to vector<256xf32>
    %22 = vector.shape_cast %21 : vector<256xf32> to vector<1x256xf32>
    %23 = tpu.iota {dimensions = array<i32: 0>} : vector<4x256xi32>
    %c0_6 = arith.constant 0 : index
    %c0_7 = arith.constant 0 : index
    %24 = vector.load %arg4[%c0_6, %c0_7] : memref<1x256xi32, #tpu.memory_space<vmem>>, vector<1x256xi32>
    %25 = vector.broadcast %24 : vector<1x256xi32> to vector<4x256xi32>
    %26 = arith.cmpi eq, %23, %25 : vector<4x256xi32>
    %27 = arith.extui %26 : vector<4x256xi1> to vector<4x256xi32>
    %28 = arith.sitofp %27 : vector<4x256xi32> to vector<4x256xf32>
    %c0_8 = arith.constant 0 : index
    %c0_9 = arith.constant 0 : index
    %29 = vector.load %arg5[%c0_8, %c0_9] : memref<4x1xf32, #tpu.memory_space<vmem>>, vector<4x1xf32>
    %30 = vector.broadcast %29 : vector<4x1xf32> to vector<4x256xf32>
    %31 = arith.mulf %28, %30 : vector<4x256xf32>
    %cst_10 = arith.constant dense<0.000000e+00> : vector<256xf32>
    %32 = vector.multi_reduction <add>, %31, %cst_10 [0] : vector<4x256xf32> to vector<256xf32>
    %33 = vector.shape_cast %32 : vector<256xf32> to vector<1x256xf32>
    %cst_11 = arith.constant 0.000000e+00 : f32
    %34 = vector.broadcast %cst_11 : f32 to vector<1x256xf32>
    %35 = arith.subf %34, %33 : vector<1x256xf32>
    %cst_12 = arith.constant 1.000000e+00 : f32
    %36 = vector.broadcast %cst_12 : f32 to vector<1x256xf32>
    %37 = arith.subf %36, %22 : vector<1x256xf32>
    %38 = arith.mulf %37, %37 : vector<1x256xf32>
    %39 = arith.mulf %35, %38 : vector<1x256xf32>
    %40 = arith.mulf %39, %22 : vector<1x256xf32>
    %c1_i32 = arith.constant 1 : i32
    %41 = arith.muli %arg0, %c1_i32 : i32
    %42 = arith.addi %41, %arg1 : i32
    %c256_i32 = arith.constant 256 : i32
    %43 = arith.muli %42, %c256_i32 : i32
    %44 = tpu.iota {dimensions = array<i32: 1>} : vector<1x256xi32>
    %45 = vector.broadcast %43 : i32 to vector<1x256xi32>
    %46 = arith.addi %45, %44 : vector<1x256xi32>
    %c200_i32 = arith.constant 200 : i32
    %47 = vector.broadcast %c200_i32 : i32 to vector<1x256xi32>
    %48 = arith.cmpi slt, %46, %47 : vector<1x256xi32>
    %cst_13 = arith.constant 0.000000e+00 : f32
    %49 = vector.broadcast %cst_13 : f32 to vector<1x256xf32>
    %50 = arith.select %48, %40, %49 : vector<1x256xi1>, vector<1x256xf32>
    %c0_14 = arith.constant 0 : index
    %c0_15 = arith.constant 0 : index
    %51 = vector.load %arg7[%c0_14, %c0_15] : memref<1x256xf32, #tpu.memory_space<vmem>>, vector<1x256xf32>
    %52 = arith.addf %51, %50 : vector<1x256xf32>
    %c0_16 = arith.constant 0 : index
    %c0_17 = arith.constant 0 : index
    %53 = vector.load %arg7[%c0_16, %c0_17] : memref<1x256xf32, #tpu.memory_space<vmem>>, vector<1x256xf32>
    tpu.vector_store %arg7[%c0_16, %c0_17], %52 {strides = array<i32>} : memref<1x256xf32, #tpu.memory_space<vmem>>, vector<1x256xf32>,
    %c0_i32_18 = arith.constant 0 : i32
    %54 = arith.cmpi eq, %arg1, %c0_i32_18 : i32
    %55 = arith.extui %54 : i1 to i32
    %c0_i32_19 = arith.constant 0 : i32
    %56 = arith.cmpi ne, %55, %c0_i32_19 : i32
    scf.if %56 {
      %c0_20 = arith.constant 0 : index
      %c0_21 = arith.constant 0 : index
      %57 = vector.load %arg7[%c0_20, %c0_21] : memref<1x256xf32, #tpu.memory_space<vmem>>, vector<1x256xf32>
      %cst_22 = arith.constant dense<0.000000e+00> : vector<1xf32>
      %58 = vector.multi_reduction <add>, %57, %cst_22 [1] : vector<1x256xf32> to vector<1xf32>
      %59 = vector.shape_cast %58 : vector<1xf32> to vector<1x1xf32>
      %c0_23 = arith.constant 0 : index
      %c0_24 = arith.constant 0 : index
      %60 = vector.load %arg6[%c0_23, %c0_24] : memref<1x1xf32, #tpu.memory_space<vmem>>, vector<1x1xf32>
      tpu.vector_store %arg6[%c0_23, %c0_24], %59 {strides = array<i32>} : memref<1x1xf32, #tpu.memory_space<vmem>>, vector<1x1xf32>,
    } else {
    }
    return
  }
  func.func @transform_0(%arg0: i32, %arg1: i32) -> (i32, i32) {
    %c1_i32 = arith.constant 1 : i32
    %0 = arith.muli %arg0, %c1_i32 : i32
    %1 = arith.addi %0, %arg1 : i32
    %c0_i32 = arith.constant 0 : i32
    %c0_i32_0 = arith.constant 0 : i32
    return %c0_i32, %1 : i32, i32
  }
  func.func @transform_1(%arg0: i32, %arg1: i32) -> (i32, i32) {
    %c1_i32 = arith.constant 1 : i32
    %0 = arith.muli %arg0, %c1_i32 : i32
    %1 = arith.addi %0, %arg1 : i32
    %c0_i32 = arith.constant 0 : i32
    %c0_i32_0 = arith.constant 0 : i32
    return %c0_i32, %1 : i32, i32
  }
  func.func @transform_2(%arg0: i32, %arg1: i32) -> (i32, i32) {
    %c1_i32 = arith.constant 1 : i32
    %0 = arith.muli %arg0, %c1_i32 : i32
    %1 = arith.addi %0, %arg1 : i32
    %c0_i32 = arith.constant 0 : i32
    %c0_i32_0 = arith.constant 0 : i32
    return %c0_i32, %1 : i32, i32
  }
  func.func @transform_3(%arg0: i32, %arg1: i32) -> (i32, i32) {
    %c0_i32 = arith.constant 0 : i32
    %c0_i32_0 = arith.constant 0 : i32
    %c0_i32_1 = arith.constant 0 : i32
    return %c0_i32, %c0_i32_0 : i32, i32
  }
  func.func @transform_4(%arg0: i32, %arg1: i32) -> (i32, i32) {
    %c0_i32 = arith.constant 0 : i32
    %c0_i32_0 = arith.constant 0 : i32
    return %arg0, %c0_i32 : i32, i32
  }
}

</mosaic_0001>

<bundles_post_ra>
// kernel: run.1
= control target key start
LH: loop header
LB: loop body
LE: loop exit
PB: predicated region body
PF: predicated region fallthrough
CT: control target
= control target key end

     0   :  { %v82_v1 = vlaneseq  ;;  %v362_v2 = vmov 0   ;;  %v363_v10 = vmov 0.0   ;;  %s455_s0 = inlined_call_operand.vmem [shape: f32[16,256], index: 0, kind: input, shape index: {}]   ;;  %s456_s1 = inlined_call_operand.vmem [shape: s32[1,256], index: 1, kind: input, shape index: {}]   ;;  %s457_s2 = inlined_call_operand.vmem [shape: s32[1,256], index: 2, kind: input, shape index: {}]   ;;  %s458_s3 = inlined_call_operand.vmem [shape: f32[4,1], index: 3, kind: input, shape index: {}]   ;;  %s459_s4 = inlined_call_operand.hbm [shape: f32[1,1], index: 4, kind: output, shape index: {}]  }
   0x1   :  { %v196_v0 = vld [vmem:[%s458_s3] sm:$0xf]  ;;  %325 = vset.pattern.permute.xlu0 %v362_v2  ;;  %v88_v4 = vld [vmem:[%s455_s0 + $0x8] sm:$0xff]  ;;  %v89_v5 = vld [vmem:[%s455_s0 + $0x10] sm:$0xff] }
   0x2   :  { %v87_v3 = vld [vmem:[%s455_s0] sm:$0xff]  ;;  %199 = vperm.xlu0 %325, %v196_v0   ;;  %vm404_vm0 = vcmp.lt.s32.totalorder %v82_v1, 256  ;;  %v90_v7 = vld [vmem:[%s455_s0 + $0x18] sm:$0xff]  ;;  %v412_v9 = vshrl.u32 %v82_v1, 7 }
   0x3   :  { %v91_v8 = vmax.f32 %v87_v3, %v89_v5  ;;  %86 = vst.msk [vmem:[#allocation2] sm:$0x3] %vm404_vm0, %v363_v10  ;;  %v98_v11 = vmax.f32 %v88_v4, %v90_v7  ;;  %v142_v12 = vld [vmem:[%s456_s1] sm:$0x3] }
   0x4   :  { %v181_v13 = vld [vmem:[%s457_s2] sm:$0x3] }
   0x5   :  { %9 = vsyncpa [#allocation4], 0  ;;  %v92_v14 = vrot.slane %v91_v8, 4  ;;  %v141_v15 = vadd.s32 8, %v412_v9  ;;  %v424_v16 = vsub.s32 0, %v412_v9  ;;  %v427_v17 = vsub.s32 1, %v412_v9 }
   0x6   :  { %v99_v18 = vrot.slane %v98_v11, 4  ;;  %vm204_vm7 = vcmask 1043456   ;;  %vm281_vm9 = vcmask 1040384   ;;  %s365_s0 = smov [#allocation3]   ;;  %vm287_vm10 = vcmask 0  }
   0x7   :  { %v93_v19 = vmax.f32 %v91_v8, %v92_v14  ;;  %v146_v20 = vrot.slane %v142_v12, %v424_v16  ;;  %v150_v21 = vrot.slane %v142_v12, %v427_v17  ;;  %v185_v22 = vrot.slane %v181_v13, %v424_v16  ;;  %s295_s1 = sshll.u32 %s365_s0, 4  ;;  %s296_s1 = int_to_ptr.vmem [resolvable:$true] %s295_s1 }
   0x8   :  { %v100_v23 = vmax.f32 %v98_v11, %v99_v18  ;;  %v189_v24 = vrot.slane %v181_v13, %v427_v17  ;;  %s338_s2 = scalar_lea.vmem %s296_s1, 16  ;;  %s342_s28 = scalar_lea.vmem %s296_s1, 32 }
   0x9   :  { %v94_v25 = vrot.slane %v93_v19, 2  ;;  %vm151_vm1 = vcmp.eq.s32.totalorder %v412_v9, %v146_v20  ;;  %vm152_vm2 = vcmp.eq.s32.totalorder %v412_v9, %v150_v21  ;;  %vm153_vm3 = vcmp.eq.s32.totalorder %v141_v15, %v146_v20  ;;  %p339_p0 = scmp.ne.s32.totalorder %s296_s1, %s338_s2  ;;  %p343_p1 = scmp.lt.s32.totalorder %s296_s1, %s296_s1 }
   0xa   :  { %v101_v26 = vrot.slane %v100_v23, 2  ;;  %vm154_vm4 = vcmp.eq.s32.totalorder %v141_v15, %v150_v21  ;;  %v315_v27 = vsel %vm151_vm1, 1.0, %v363_v10  ;;  %v316_v28 = vsel %vm152_vm2, 1.0, %v363_v10  ;;  %p344_p2 = scmp.lt.s32.totalorder %s342_s28, %s338_s2 }
   0xb   :  { %v95_v29 = vmax.f32 %v93_v19, %v94_v25  ;;  %v317_v30 = vsel %vm153_vm3, 1.0, %v363_v10  ;;  %v318_v31 = vsel %vm154_vm4, 1.0, %v363_v10  ;;  %vm190_vm5 = vcmp.eq.s32.totalorder %v412_v9, %v185_v22 }
   0xc   :  { %v102_v32 = vmax.f32 %v100_v23, %v101_v26  ;;  %vm191_vm6 = vcmp.eq.s32.totalorder %v412_v9, %v189_v24  ;;  %v319_v33 = vsel %vm190_vm5, 1.0, %v363_v10  ;;  %p345_p3 = por %p344_p2, %p343_p1 }
   0xd   :  { %v96_v34 = vrot.slane %v95_v29, 1  ;;  %v320_v35 = vsel %vm191_vm6, 1.0, %v363_v10 }
   0xe   :  { %v103_v36 = vrot.slane %v102_v32, 1  ;;  %p346_p4 = pnand %p345_p3, %p339_p0 }
   0xf   :  { %v97_v37 = vmax.f32 %v95_v29, %v96_v34 }
  0x10   :  { %v104_v38 = vmax.f32 %v102_v32, %v103_v36 }
  0x11   :  { %v105_v39 = vsub.f32 %v87_v3, %v97_v37  ;;  %v107_v40 = vsub.f32 %v89_v5, %v97_v37 }
  0x12   :  { %v106_v41 = vsub.f32 %v88_v4, %v104_v38  ;;  %v108_v42 = vsub.f32 %v90_v7, %v104_v38 }
  0x13   :  { %v109_v43 = vmul.f32 1.442695, %v105_v39  ;;  %v113_v44 = vmul.f32 1.442695, %v107_v40 }
  0x14   :  { %v111_v45 = vmul.f32 1.442695, %v106_v41  ;;  %v115_v46 = vmul.f32 1.442695, %v108_v42 }
  0x15   :  { %326 = vpow2.f32 %v109_v43 }
  0x16   :  { %328 = vpow2.f32 %v111_v45 }
  0x17   :  { %330 = vpow2.f32 %v113_v44 }
  0x18   :  { %332 = vpow2.f32 %v115_v46 }
  0x1f   :  { %v327_v47 = vpop.eup %326 }
  0x20   :  { %v329_v48 = vpop.eup %328 }
  0x21   :  { %v331_v49 = vpop.eup %330 }
  0x22   :  { %v333_v50 = vpop.eup %332  ;;  %v117_v51 = vadd.f32 %v331_v49, %v327_v47  ;;  %v232_v49 = vand.u32 127, %v82_v1 }
  0x23   :  { %v124_v52 = vadd.f32 %v333_v50, %v329_v48  ;;  %v364_v50 = vmov 1966171168  }
  0x24   :  { %v118_v53 = vrot.slane %v117_v51, 4 }
  0x25   :  { %v125_v54 = vrot.slane %v124_v52, 4 }
  0x26   :  { %v119_v55 = vadd.f32 %v118_v53, %v117_v51  ;;  %v246_v51 = vunpack.c.l.s4 %v364_v50 }
  0x27   :  { %v126_v56 = vadd.f32 %v125_v54, %v124_v52 }
  0x28   :  { %v120_v57 = vrot.slane %v119_v55, 2 }
  0x29   :  { %v127_v58 = vrot.slane %v126_v56, 2 }
  0x2a   :  { %v121_v59 = vadd.f32 %v120_v57, %v119_v55 }
  0x2b   :  { %v128_v60 = vadd.f32 %v127_v58, %v126_v56  ;;  %v233_v56 = vadd.s32 128, %v232_v49 }
  0x2c   :  { %v122_v61 = vrot.slane %v121_v59, 1 }
  0x2d   :  { %v129_v62 = vrot.slane %v128_v60, 1  ;;  %vm238_vm8 = vcmp.lt.s32.totalorder %v233_v56, 200 }
  0x2e   :  { %v123_v63 = vadd.f32 %v122_v61, %v121_v59  ;;  %v247_v59 = vunpack.c.0.s8 %v246_v51 }
  0x2f   :  { %v130_v0 = vadd.f32 %v129_v62, %v128_v60 }
  0x30   :  { %334 = vlog2.f32 %v123_v63 }
  0x31   :  { %336 = vlog2.f32 %v130_v0  ;;  %v250_v0 = vsub.s32 %v247_v59, %v412_v9 }
  0x3a   :  { %v335_v2 = vpop.eup %334 }
  0x3b   :  { %v337_v3 = vpop.eup %336  ;;  %v132_v4 = vmul.f32 0.6931472, %v335_v2 }
  0x3c   :  { %v134_v5 = vmul.f32 0.6931472, %v337_v3 }
  0x3d   :  { %v135_v7 = vsub.f32 %v105_v39, %v132_v4  ;;  %v137_v8 = vsub.f32 %v107_v40, %v132_v4  ;;  %v241_v4 = vld [vmem:[#allocation2] sm:$0x3] }
  0x3e   :  { %v136_v10 = vsub.f32 %v106_v41, %v134_v5  ;;  %v138_v11 = vsub.f32 %v108_v42, %v134_v5 }
  0x3f   :  { %v163_v12 = vmul.f32 %v315_v27, %v135_v7  ;;  %v165_v13 = vmul.f32 %v317_v30, %v137_v8 }
  0x40   :  { %v164_v14 = vmul.f32 %v316_v28, %v136_v10  ;;  %v166_v15 = vmul.f32 %v318_v31, %v138_v11 }
  0x41   :  { %v167_v18 = vadd.f32 %v165_v13, %v163_v12 }
  0x42   :  { %v174_v19 = vadd.f32 %v166_v15, %v164_v14 }
  0x43   :  { %v168_v20 = vrot.slane %v167_v18, 4 }
  0x44   :  { %v175_v21 = vrot.slane %v174_v19, 4 }
  0x45   :  { %v169_v22 = vadd.f32 %v168_v20, %v167_v18 }
  0x46   :  { %v176_v23 = vadd.f32 %v175_v21, %v174_v19 }
  0x47   :  { %v170_v24 = vrot.slane %v169_v22, 2 }
  0x48   :  { %v177_v25 = vrot.slane %v176_v23, 2 }
  0x49   :  { %v171_v26 = vadd.f32 %v170_v24, %v169_v22 }
  0x4a   :  { %v178_v29 = vadd.f32 %v177_v25, %v176_v23 }
  0x4b   :  { %v172_v37 = vrot.slane %v171_v26, 1 }
  0x4c   :  { %v179_v38 = vrot.slane %v178_v29, 1 }
  0x4d   :  { %v173_v39 = vadd.f32 %v172_v37, %v171_v26 }
  0x4e   :  { %v180_v40 = vadd.f32 %v179_v38, %v178_v29 }
  0x4f   :  { %v221_v47 = vsub.f32 1.0, %v173_v39 }
  0x50   :  { %v222_v48 = vsub.f32 1.0, %v180_v40 }
  0x51   :  { %v223_v54 = vmul.f32 %v221_v47, %v221_v47 }
  0x52   :  { %v224_v55 = vmul.f32 %v222_v48, %v222_v48 }
  0x81   :  { %v200_v32 = vpop.permute.xlu0 %199 }
  0x82   :  { %v202_v34 = vmul.f32 %v319_v33, %v200_v32  ;;  %v203_v36 = vmul.f32 %v320_v35, %v200_v32 }
  0x84   :  { %v205_v27 = vsel %vm204_vm7, %v202_v34, 0.0  ;;  %v212_v30 = vsel %vm204_vm7, %v203_v36, 0.0 }
  0x85   :  { %v206_v28 = vrot.slane %v205_v27, 4  ;;  %v213_v31 = vrot.slane %v212_v30, 4 }
  0x87   :  { %v207_v41 = vadd.f32 %v206_v28, %v205_v27  ;;  %v214_v42 = vadd.f32 %v213_v31, %v212_v30 }
  0x89   :  { %v208_v43 = vrot.slane %v207_v41, 2  ;;  %v215_v44 = vrot.slane %v214_v42, 2 }
  0x8b   :  { %v209_v45 = vadd.f32 %v208_v43, %v207_v41  ;;  %v216_v46 = vadd.f32 %v215_v44, %v214_v42 }
  0x8d   :  { %v210_v33 = vrot.slane %v209_v45, 1  ;;  %v217_v35 = vrot.slane %v216_v46, 1 }
  0x8f   :  { %v211_v52 = vadd.f32 %v210_v33, %v209_v45  ;;  %v218_v53 = vadd.f32 %v217_v35, %v216_v46 }
  0x91   :  { %v219_v57 = vsub.f32 0.0, %v211_v52  ;;  %v220_v58 = vsub.f32 0.0, %v218_v53 }
  0x93   :  { %v225_v60 = vmul.f32 %v223_v54, %v219_v57  ;;  %v226_v61 = vmul.f32 %v224_v55, %v220_v58 }
  0x95   :  { %v227_v62 = vmul.f32 %v225_v60, %v173_v39  ;;  %v228_v63 = vmul.f32 %v226_v61, %v180_v40 }
  0x97   :  { %v240_v1 = vsel %vm238_vm8, %v228_v63, 0.0 }
  0x98   :  { %v244_v2 = vcombine.low %v227_v62, %v240_v1 }
  0x9a   :  { %v251_v3 = vrot.slane %v244_v2, %v250_v0 }
  0x9c   :  { %v258_v5 = vrot.slane %v251_v3, %v250_v0 }
  0x9e   :  { %v260_v7 = vadd.f32 %v258_v5, %v241_v4 }
  0xa0   :  { %265 = vst.msk [vmem:[#allocation2] sm:$0x3] %vm404_vm0, %v260_v7 }
  0xa7   :  { %v269_v8 = vld [vmem:[#allocation2] sm:$0x3] }
  0xa8   :  { %v274_v10 = vrot.slane %v269_v8, %v424_v16  ;;  %v278_v11 = vrot.slane %v269_v8, %v427_v17 }
  0xaa   :  { %v282_v12 = vsel %vm281_vm9, %v274_v10, 0.0  ;;  %v283_v13 = vsel %vm281_vm9, %v278_v11, 0.0 }
  0xab   :  { %v284_v14 = vadd.f32 %v283_v13, %v282_v12 }
  0xad   :  { %285 = vadd.xlane.f32.xlu0 %v284_v14 }
 0x13a   :  { %v286_v9 = vpop.xlane.xlu0 %285 }
 0x13b   :  { %288 = vst.msk [vmem:[#allocation3] sm:$0x1] %vm287_vm10, %v286_v9 }
 0x13c   :  { %349 = shalt.err (!%p346_p4)
}
 0x13d   :  { %s350_s5 = scalar_lea.hbm %s459_s4, 16 }
 0x13e   :  { %p351_p5 = scmp.ne.s32.totalorder %s459_s4, %s350_s5  ;;  %p354_p6 = scmp.lt.u32.totalorder %s350_s5, %s459_s4 }
 0x140   :  { %p356_p7 = pnand %p354_p6, %p351_p5 }
 0x142   :  { %359 = shalt.err (!%p356_p7)
}
 0x143   :  { %298 = dma.vmem_to_hbm [thread:$0]  %s296_s1, 16, %s459_s4, [#allocation4]  }
 0x144   :  { %360 = dma.done.wait [#allocation4], 16  }
 0x145   :  { %361 = vsyncadd [#allocation4], 4294967280 }
 0x146   :  { %302 = vsyncpa [#allocation4], 1 }

</bundles_post_ra>
